<compile_context>
chip_gen: v7x
topology: tpu7x:2x2x1
jax: 0.10.0
libtpu: 0.0.40
codegen_flags: <defaults>
</compile_context>

<pallas_src>
import functools

import jax
import jax.numpy as jnp
from jax.experimental import pallas as pl
from jax.experimental.pallas import tpu as pltpu


def _time_embed_kernel(thr_ref, x_ref, o_ref, *, row_block: int):
    """One grid step processes a (block_rows, row_block) lane-dense tile.

    thr_ref : VMEM tile, int32   (block_rows, 1)        -- seq_len * D per row
    x_ref   : VMEM tile, float32 (block_rows, row_block)
    o_ref   : VMEM tile, float32 (block_rows, row_block)
    """
    # Absolute flattened column (= t*D + d) of each element in this tile.
    # time index t maps to lanes [t*D, (t+1)*D), so  t < len  <=>  lane < len*D.
    col0 = pl.program_id(1) * row_block
    lane = col0 + jax.lax.broadcasted_iota(jnp.int32, o_ref.shape, 1)
    o_ref[...] = jnp.where(lane < thr_ref[...], x_ref[...], 0.0)


def _half_block(n: int, m: int):
    """Largest multiple of m that is <= n // 2, or None if n can't be split."""
    if n < 2 * m:
        return None
    return ((n // 2) // m) * m


def _choose_tiles(B: int, row: int, target_bytes: int):
    """Pick (block_rows, row_block) for the lane-dense [B, row] f32 view.

    Respects the (8, 128) block constraint (multiple or full extent), charges
    the 128-lane padding of the (block_rows, 1) int32 threshold tile, and
    guarantees >= 2 grid steps for non-trivial problems (v7x dual-TC).
    """
    elem = 4
    lens_pad_lanes = 128  # (N, 1) int32 VMEM tile pads to 128 lanes

    # Lane (column) block: take the full row when it fits the per-buffer
    # budget at the minimum sublane count, else a multiple of 128 lanes.
    min_rows = B if B < 8 else 8
    max_cols = max(128, target_bytes // (min_rows * elem))
    row_block = row if row <= max_cols else (max_cols // 128) * 128

    # Sublane (row) block from the per-buffer budget; each tile row costs the
    # x row plus the lane-padded threshold row.
    row_cost = (row_block + lens_pad_lanes) * elem
    max_rows = max(1, target_bytes // row_cost)
    if B <= 8 or max_rows >= B:
        block_rows = B
    else:
        block_rows = max(8, (max_rows // 8) * 8)

    # v7x has two TensorCores: make sure a "parallel" axis has >= 2 steps
    # whenever the problem is big enough for the split to matter.
    total_bytes = B * row * elem
    if total_bytes > (2 << 20) and pl.cdiv(B, block_rows) * pl.cdiv(row, row_block) < 2:
        half_rows = _half_block(B, 8)
        if half_rows is not None:
            block_rows = half_rows
        else:
            half_cols = _half_block(row, 128)
            if half_cols is not None:
                row_block = half_cols

    return block_rows, row_block


def _vmem_budget():
    """(target_tile_bytes, vmem_limit_bytes) sized to the local TPU generation."""
    try:
        vmem = pltpu.get_tpu_info().vmem_capacity_bytes
    except Exception:
        vmem = 64 << 20  # conservative fallback (treated like v7x below)
    if vmem >= (96 << 20):        # v5e / v6e: 128 MiB physical VMEM
        return 8 << 20, 64 << 20
    return 4 << 20, 32 << 20      # v7x: 64 MiB physical, keep headroom


def time_embedding(x, seq_lengths, *, target_tile_bytes=None,
                   vmem_limit_bytes=None, donate_x: bool = False):
    """Pallas TimeEmbedding forward.

    x           : float32 [B, T, D]  (raw, possibly garbage past seq_lengths)
    seq_lengths : int32   [B]
    returns     : float32 [B, T, D]  zero-padded past each sequence length
    """
    x = x.astype(jnp.float32)
    seq_lengths = seq_lengths.astype(jnp.int32)
    B, T, D = x.shape
    row = T * D
    assert row < 2**31, "flattened row (T*D) must fit in int32 lane indices"

    if target_tile_bytes is None or vmem_limit_bytes is None:
        tb, vb = _vmem_budget()
        target_tile_bytes = target_tile_bytes or tb
        vmem_limit_bytes = vmem_limit_bytes or vb

    # Lane-dense view: last dim is the full flattened row; precompute the
    # per-row lane threshold on the host (no in-kernel multiply).
    x2 = x.reshape(B, row)
    thr2 = (seq_lengths * D).reshape(B, 1)

    block_rows, row_block = _choose_tiles(B, row, target_tile_bytes)
    grid = (pl.cdiv(B, block_rows), pl.cdiv(row, row_block))

    out2 = pl.pallas_call(
        functools.partial(_time_embed_kernel, row_block=row_block),
        out_shape=jax.ShapeDtypeStruct((B, row), jnp.float32),
        grid=grid,
        in_specs=[
            pl.BlockSpec((block_rows, 1), lambda i, j: (i, 0)),          # thresholds
            pl.BlockSpec((block_rows, row_block), lambda i, j: (i, j)),  # x (flat)
        ],
        out_specs=pl.BlockSpec((block_rows, row_block), lambda i, j: (i, j)),
        compiler_params=pltpu.CompilerParams(
            dimension_semantics=("parallel", "parallel"),
            vmem_limit_bytes=vmem_limit_bytes,
        ),
        cost_estimate=pl.CostEstimate(
            flops=0,
            transcendentals=0,
            bytes_accessed=2 * B * row * 4 + B * 4,
        ),
        input_output_aliases=({1: 0} if donate_x else {}),
    )(thr2, x2)

    return out2.reshape(B, T, D)


def _reference(x, seq_lengths):
    t_idx = jnp.arange(x.shape[1])[None, :, None]               # [1, T, 1]
    return jnp.where(t_idx < seq_lengths[:, None, None], x.astype(jnp.float32), 0.0)


if __name__ == "__main__":
    key = jax.random.PRNGKey(0)
    k1, k2, k3, k4, k5 = jax.random.split(key, 5)

    # Small shapes consistent with the module's forward:
    #   batch=2, max timestamp-seq length=8, date2vec_size=16
    B, T, D = 2, 8, 16
    x_raw = jax.random.normal(k1, (B, T, D), dtype=jnp.float32)
    seq_lengths = jnp.array([5, 8], dtype=jnp.int32)

    out = jax.block_until_ready(time_embedding(x_raw, seq_lengths))
    assert out.shape == (B, T, D) and out.dtype == jnp.float32
    assert jnp.array_equal(out, _reference(x_raw, seq_lengths))

    # Multi-row-block path (partial last block, block_rows=8).
    B2, T2, D2 = 33, 8, 16
    x2_raw = jax.random.normal(k2, (B2, T2, D2), dtype=jnp.float32)
    lens2 = jax.random.randint(k3, (B2,), 0, T2 + 1, dtype=jnp.int32)
    out2 = jax.block_until_ready(
        time_embedding(x2_raw, lens2, target_tile_bytes=2048))
    assert jnp.array_equal(out2, _reference(x2_raw, lens2))

    # Multi-column-block path (row split across the lane grid axis).
    B3, T3, D3 = 4, 64, 32
    x3_raw = jax.random.normal(k4, (B3, T3, D3), dtype=jnp.float32)
    lens3 = jax.random.randint(k5, (B3,), 0, T3 + 1, dtype=jnp.int32)
    out3 = jax.block_until_ready(
        time_embedding(x3_raw, lens3, target_tile_bytes=4096))
    assert jnp.array_equal(out3, _reference(x3_raw, lens3))

    print("KERNEL_OK")
</pallas_src>

<mosaic_0001>
module attributes {stable_mosaic.version = 11 : i64} {
  func.func @_time_embed_kernel(%arg0: i32, %arg1: i32, %arg2: memref<2x1xi32, #tpu.memory_space<vmem>>, %arg3: memref<2x128xf32, #tpu.memory_space<vmem>>, %arg4: memref<2x128xf32, #tpu.memory_space<vmem>>) attributes {dimension_semantics = [#tpu.dimension_semantics<parallel>, #tpu.dimension_semantics<parallel>], iteration_bounds = array<i64: 1, 1>, scalar_prefetch = 0 : i64, scratch_operands = 0 : i64, tpu.core_type = #tpu.core_type<tc>, window_params = [{transform_indices = @transform_0, window_bounds = array<i64: 2, 1>}, {transform_indices = @transform_1, window_bounds = array<i64: 2, 128>}, {transform_indices = @transform_2, window_bounds = array<i64: 2, 128>}]} {
    %c128_i32 = arith.constant 128 : i32
    %0 = arith.muli %arg1, %c128_i32 : i32
    %1 = tpu.iota {dimensions = array<i32: 1>} : vector<2x128xi32>
    %2 = vector.broadcast %0 : i32 to vector<2x128xi32>
    %3 = arith.addi %2, %1 : vector<2x128xi32>
    %c0 = arith.constant 0 : index
    %c0_0 = arith.constant 0 : index
    %4 = vector.load %arg2[%c0, %c0_0] : memref<2x1xi32, #tpu.memory_space<vmem>>, vector<2x1xi32>
    %5 = vector.broadcast %4 : vector<2x1xi32> to vector<2x128xi32>
    %6 = arith.cmpi slt, %3, %5 : vector<2x128xi32>
    %c0_1 = arith.constant 0 : index
    %c0_2 = arith.constant 0 : index
    %7 = vector.load %arg3[%c0_1, %c0_2] : memref<2x128xf32, #tpu.memory_space<vmem>>, vector<2x128xf32>
    %cst = arith.constant 0.000000e+00 : f32
    %8 = vector.broadcast %cst : f32 to vector<2x128xf32>
    %9 = arith.select %6, %7, %8 : vector<2x128xi1>, vector<2x128xf32>
    %c0_3 = arith.constant 0 : index
    %c0_4 = arith.constant 0 : index
    %10 = vector.load %arg4[%c0_3, %c0_4] : memref<2x128xf32, #tpu.memory_space<vmem>>, vector<2x128xf32>
    tpu.vector_store %arg4[%c0_3, %c0_4], %9 {strides = array<i32>} : memref<2x128xf32, #tpu.memory_space<vmem>>, vector<2x128xf32>,
    return
  }
  func.func @transform_0(%arg0: i32, %arg1: i32) -> (i32, i32) {
    %c0_i32 = arith.constant 0 : i32
    %c0_i32_0 = arith.constant 0 : i32
    return %arg0, %c0_i32 : i32, i32
  }
  func.func @transform_1(%arg0: i32, %arg1: i32) -> (i32, i32) {
    %c0_i32 = arith.constant 0 : i32
    return %arg0, %arg1 : i32, i32
  }
  func.func @transform_2(%arg0: i32, %arg1: i32) -> (i32, i32) {
    %c0_i32 = arith.constant 0 : i32
    return %arg0, %arg1 : i32, i32
  }
}

</mosaic_0001>

<bundles_post_ra>
// kernel: tpu_custom_call.1
= control target key start
LH: loop header
LB: loop body
LE: loop exit
PB: predicated region body
PF: predicated region fallthrough
CT: control target
= control target key end

     0   :  { %v66_v1 = vmov 0   ;;  %s101_s0 = inlined_call_operand.vmem [shape: s32[2,1], index: 0, kind: input, shape index: {}]   ;;  %s102_s1 = inlined_call_operand.vmem [shape: f32[2,128], index: 1, kind: input, shape index: {}]   ;;  %s103_s2 = inlined_call_operand.hbm [shape: f32[2,128], index: 2, kind: output, shape index: {}]  }
   0x1   :  { %v17_v0 = vld [vmem:[%s101_s0] sm:$0x3]  ;;  %41 = vset.pattern.permute.xlu0 %v66_v1 }
   0x2   :  { %7 = vsyncpa [#allocation3], 0  ;;  %19 = vperm.xlu0 %41, %v17_v0   ;;  %v13_v2 = vlaneseq  ;;  %s67_s11 = smov [#allocation2]   ;;  %v22_v4 = vld [vmem:[%s102_s1] sm:$0x3] }
   0x3   :  { %s31_s12 = sshll.u32 %s67_s11, 4  ;;  %s32_s12 = int_to_ptr.vmem [resolvable:$true] %s31_s12 }
   0x4   :  { %v14_v3 = vand.u32 127, %v13_v2  ;;  %s42_s15 = scalar_lea.vmem %s32_s12, 32  ;;  %p47_p1 = scmp.lt.s32.totalorder %s32_s12, %s32_s12 }
   0x5   :  { %p43_p0 = scmp.ne.s32.totalorder %s32_s12, %s42_s15  ;;  %p48_p2 = scmp.lt.s32.totalorder %s42_s15, %s42_s15 }
   0x7   :  { %p49_p3 = por %p48_p2, %p47_p1 }
   0x9   :  { %p50_p4 = pnand %p49_p3, %p43_p0 }
  0x81   :  { %v20_v5 = vpop.permute.xlu0 %19 }
  0x82   :  { %vm21_vm0 = vcmp.lt.s32.totalorder %v14_v3, %v20_v5 }
  0x83   :  { %v23_v6 = vsel %vm21_vm0, %v22_v4, 0.0 }
  0x84   :  { %24 = vst [vmem:[#allocation2] sm:$0x3] %v23_v6 }
  0x85   :  { %53 = shalt.err (!%p50_p4)
}
  0x86   :  { %s54_s17 = scalar_lea.hbm %s103_s2, 32 }
  0x87   :  { %p55_p5 = scmp.ne.s32.totalorder %s103_s2, %s54_s17  ;;  %p58_p6 = scmp.lt.u32.totalorder %s54_s17, %s103_s2 }
  0x89   :  { %p60_p7 = pnand %p58_p6, %p55_p5 }
  0x8b   :  { %63 = shalt.err (!%p60_p7)
}
  0x8c   :  { %34 = dma.vmem_to_hbm [thread:$0]  %s32_s12, 32, %s103_s2, [#allocation3]  }
  0x8d   :  { %64 = dma.done.wait [#allocation3], 32  }
  0x8e   :  { %65 = vsyncadd [#allocation3], 4294967264 }
  0x8f   :  { %38 = vsyncpa [#allocation3], 1 }

</bundles_post_ra>
